<compile_context>
chip_gen: v6e
topology: v6e:2x2x1
jax: 0.10.0
libtpu: 0.0.40
codegen_flags: <defaults>
</compile_context>

<pallas_src>
import jax
import jax.numpy as jnp
from jax.experimental import pallas as pl
from jax.experimental.pallas import tpu as pltpu


def _round_up(x, m):
    return ((x + m - 1) // m) * m


def dqn_kernel(x_ref, w1_ref, b1_ref, w2_ref, b2_ref, o_ref):
    # Fused: matmul -> bias -> ReLU -> matmul -> bias, all on fp32 accumulators.
    x = x_ref[...]                                                   # [TB, In]
    h = jnp.dot(x, w1_ref[...], preferred_element_type=jnp.float32)  # [TB, 128]
    h = jnp.maximum(h + b1_ref[...], 0.0)                            # bias + ReLU (fp32)
    o = jnp.dot(h, w2_ref[...], preferred_element_type=jnp.float32)  # [TB, OutPad]
    o_ref[...] = (o + b2_ref[...]).astype(o_ref.dtype)


def dqn_forward(x, w1, b1, w2, b2, *, tb=1024):
    """x: [B, In] fp32; w1: [In, H]; b1: [1, H]; w2: [H, Out]; b2: [1, Out]."""
    B, in_size = x.shape
    hidden = w1.shape[1]
    out_size = w2.shape[1]

    # --- lane-dense output padding (Out -> multiple of 128) -------------------
    out_pad = _round_up(out_size, 128)
    if out_pad != out_size:
        w2 = jnp.pad(w2, ((0, 0), (0, out_pad - out_size)))
        b2 = jnp.pad(b2, ((0, 0), (0, out_pad - out_size)))

    # --- batch padding / tiling (sublane-aligned, TB rows per grid step) ------
    b_pad = _round_up(max(B, 8), 8)
    tb = min(tb, b_pad)
    b_pad = _round_up(b_pad, tb)
    if b_pad != B:
        x = jnp.pad(x, ((0, b_pad - B), (0, 0)))

    grid = (b_pad // tb,)

    # x / out: blocked along batch.  Weights/biases: constant block index so
    # they stay resident in VMEM across grid steps (DMA'd once).
    in_specs = [
        pl.BlockSpec((tb, in_size), lambda i: (i, 0)),
        pl.BlockSpec((in_size, hidden), lambda i: (0, 0)),
        pl.BlockSpec((1, hidden), lambda i: (0, 0)),
        pl.BlockSpec((hidden, out_pad), lambda i: (0, 0)),
        pl.BlockSpec((1, out_pad), lambda i: (0, 0)),
    ]
    out_specs = pl.BlockSpec((tb, out_pad), lambda i: (i, 0))

    flops = 2 * b_pad * (in_size * hidden + hidden * out_pad)
    bytes_accessed = 4 * (
        b_pad * in_size + b_pad * out_pad            # activations in / out
        + in_size * hidden + hidden * out_pad        # weights
        + hidden + out_pad                           # biases
    )

    out = pl.pallas_call(
        dqn_kernel,
        out_shape=jax.ShapeDtypeStruct((b_pad, out_pad), jnp.float32),
        grid=grid,
        in_specs=in_specs,
        out_specs=out_specs,
        compiler_params=pltpu.CompilerParams(
            dimension_semantics=("parallel",),
        ),
        cost_estimate=pl.CostEstimate(
            flops=flops, transcendentals=0, bytes_accessed=bytes_accessed
        ),
    )(x, w1, b1, w2, b2)

    return out[:B, :out_size]


def init_params(key, input_size, hidden, output_size):
    # Deterministic synthetic init (PyTorch-style uniform(-1/sqrt(fan_in), +)).
    k1, k2, k3, k4 = jax.random.split(key, 4)
    lim1 = 1.0 / jnp.sqrt(jnp.float32(input_size))
    lim2 = 1.0 / jnp.sqrt(jnp.float32(hidden))
    w1 = jax.random.uniform(k1, (input_size, hidden), jnp.float32, -lim1, lim1)
    b1 = jax.random.uniform(k2, (1, hidden), jnp.float32, -lim1, lim1)
    w2 = jax.random.uniform(k3, (hidden, output_size), jnp.float32, -lim2, lim2)
    b2 = jax.random.uniform(k4, (1, output_size), jnp.float32, -lim2, lim2)
    return w1, b1, w2, b2


def _reference(x, w1, b1, w2, b2):
    return jnp.maximum(x @ w1 + b1, 0.0) @ w2 + b2


if __name__ == "__main__":
    key = jax.random.PRNGKey(0)
    kx, kp, kx2 = jax.random.split(key, 3)

    input_size = 4      # e.g. CartPole observation dim
    hidden = 128
    output_size = 2     # e.g. CartPole action dim

    w1, b1, w2, b2 = init_params(kp, input_size, hidden, output_size)

    # Small "online action selection" batch (tests padding path).
    batch = 2
    x = jax.random.normal(kx, (batch, input_size), jnp.float32)
    out = jax.block_until_ready(dqn_forward(x, w1, b1, w2, b2))
    ref = _reference(x, w1, b1, w2, b2)
    assert out.shape == (batch, output_size)
    assert jnp.allclose(out, ref, atol=1e-5, rtol=1e-5)

    # Ragged "replay minibatch" batch with a multi-step grid (tb=64 -> 3 steps).
    batch2 = 130
    x2 = jax.random.normal(kx2, (batch2, input_size), jnp.float32)
    out2 = jax.block_until_ready(dqn_forward(x2, w1, b1, w2, b2, tb=64))
    ref2 = _reference(x2, w1, b1, w2, b2)
    assert out2.shape == (batch2, output_size)
    assert jnp.allclose(out2, ref2, atol=1e-5, rtol=1e-5)

    print("KERNEL_OK")
</pallas_src>

<mosaic_0001>
module attributes {stable_mosaic.version = 11 : i64} {
  func.func @dqn_kernel(%arg0: i32, %arg1: memref<8x4xf32, #tpu.memory_space<vmem>>, %arg2: memref<4x128xf32, #tpu.memory_space<vmem>>, %arg3: memref<1x128xf32, #tpu.memory_space<vmem>>, %arg4: memref<128x128xf32, #tpu.memory_space<vmem>>, %arg5: memref<1x128xf32, #tpu.memory_space<vmem>>, %arg6: memref<8x128xf32, #tpu.memory_space<vmem>>) attributes {dimension_semantics = [#tpu.dimension_semantics<parallel>], iteration_bounds = array<i64: 1>, scalar_prefetch = 0 : i64, scratch_operands = 0 : i64, tpu.core_type = #tpu.core_type<tc>, window_params = [{transform_indices = @transform_0, window_bounds = array<i64: 8, 4>}, {pipeline_mode = #tpu.pipeline_mode<synchronous>, transform_indices = @transform_1, window_bounds = array<i64: 4, 128>}, {pipeline_mode = #tpu.pipeline_mode<synchronous>, transform_indices = @transform_2, window_bounds = array<i64: 1, 128>}, {pipeline_mode = #tpu.pipeline_mode<synchronous>, transform_indices = @transform_3, window_bounds = array<i64: 128, 128>}, {pipeline_mode = #tpu.pipeline_mode<synchronous>, transform_indices = @transform_4, window_bounds = array<i64: 1, 128>}, {transform_indices = @transform_5, window_bounds = array<i64: 8, 128>}]} {
    %c0 = arith.constant 0 : index
    %c0_0 = arith.constant 0 : index
    %0 = vector.load %arg1[%c0, %c0_0] : memref<8x4xf32, #tpu.memory_space<vmem>>, vector<8x4xf32>
    %c0_1 = arith.constant 0 : index
    %c0_2 = arith.constant 0 : index
    %1 = vector.load %arg2[%c0_1, %c0_2] : memref<4x128xf32, #tpu.memory_space<vmem>>, vector<4x128xf32>
    %cst = arith.constant dense<0.000000e+00> : vector<8x128xf32>
    %2 = tpu.matmul %0, %1, %cst {dimension_numbers = #tpu.dot_dimension_numbers<[1], [0], [0], [1], [0, 0, 1, 1], [], []>} : vector<8x4xf32>, vector<4x128xf32>, vector<8x128xf32> -> vector<8x128xf32>
    %c0_3 = arith.constant 0 : index
    %c0_4 = arith.constant 0 : index
    %3 = vector.load %arg3[%c0_3, %c0_4] : memref<1x128xf32, #tpu.memory_space<vmem>>, vector<1x128xf32>
    %4 = vector.broadcast %3 : vector<1x128xf32> to vector<8x128xf32>
    %5 = arith.addf %2, %4 : vector<8x128xf32>
    %cst_5 = arith.constant 0.000000e+00 : f32
    %6 = vector.broadcast %cst_5 : f32 to vector<8x128xf32>
    %7 = arith.maximumf %5, %6 : vector<8x128xf32>
    %c0_6 = arith.constant 0 : index
    %c0_7 = arith.constant 0 : index
    %8 = vector.load %arg4[%c0_6, %c0_7] : memref<128x128xf32, #tpu.memory_space<vmem>>, vector<128x128xf32>
    %cst_8 = arith.constant dense<0.000000e+00> : vector<8x128xf32>
    %9 = tpu.matmul %7, %8, %cst_8 {dimension_numbers = #tpu.dot_dimension_numbers<[1], [0], [0], [1], [0, 0, 1, 1], [], []>} : vector<8x128xf32>, vector<128x128xf32>, vector<8x128xf32> -> vector<8x128xf32>
    %c0_9 = arith.constant 0 : index
    %c0_10 = arith.constant 0 : index
    %10 = vector.load %arg5[%c0_9, %c0_10] : memref<1x128xf32, #tpu.memory_space<vmem>>, vector<1x128xf32>
    %11 = vector.broadcast %10 : vector<1x128xf32> to vector<8x128xf32>
    %12 = arith.addf %9, %11 : vector<8x128xf32>
    %c0_11 = arith.constant 0 : index
    %c0_12 = arith.constant 0 : index
    %13 = vector.load %arg6[%c0_11, %c0_12] : memref<8x128xf32, #tpu.memory_space<vmem>>, vector<8x128xf32>
    tpu.vector_store %arg6[%c0_11, %c0_12], %12 {strides = array<i32>} : memref<8x128xf32, #tpu.memory_space<vmem>>, vector<8x128xf32>,
    return
  }
  func.func @transform_0(%arg0: i32) -> (i32, i32) {
    %c0_i32 = arith.constant 0 : i32
    %c0_i32_0 = arith.constant 0 : i32
    return %arg0, %c0_i32 : i32, i32
  }
  func.func @transform_1(%arg0: i32) -> (i32, i32) {
    %c0_i32 = arith.constant 0 : i32
    %c0_i32_0 = arith.constant 0 : i32
    %c0_i32_1 = arith.constant 0 : i32
    return %c0_i32, %c0_i32_0 : i32, i32
  }
  func.func @transform_2(%arg0: i32) -> (i32, i32) {
    %c0_i32 = arith.constant 0 : i32
    %c0_i32_0 = arith.constant 0 : i32
    %c0_i32_1 = arith.constant 0 : i32
    return %c0_i32, %c0_i32_0 : i32, i32
  }
  func.func @transform_3(%arg0: i32) -> (i32, i32) {
    %c0_i32 = arith.constant 0 : i32
    %c0_i32_0 = arith.constant 0 : i32
    %c0_i32_1 = arith.constant 0 : i32
    return %c0_i32, %c0_i32_0 : i32, i32
  }
  func.func @transform_4(%arg0: i32) -> (i32, i32) {
    %c0_i32 = arith.constant 0 : i32
    %c0_i32_0 = arith.constant 0 : i32
    %c0_i32_1 = arith.constant 0 : i32
    return %c0_i32, %c0_i32_0 : i32, i32
  }
  func.func @transform_5(%arg0: i32) -> (i32, i32) {
    %c0_i32 = arith.constant 0 : i32
    %c0_i32_0 = arith.constant 0 : i32
    return %arg0, %c0_i32 : i32, i32
  }
}

</mosaic_0001>

<bundles_post_ra>
// kernel: tpu_custom_call.1
= control target key start
LH: loop header
LB: loop body
LE: loop exit
PB: predicated region body
PF: predicated region fallthrough
CT: control target
= control target key end

     0   :  { %10 = vsyncpa [#allocation3], 0  ;;  %s399_s0 = inlined_call_operand.vmem [shape: f32[8,4], index: 0, kind: input, shape index: {}]   ;;  %s400_s1 = inlined_call_operand.vmem [shape: f32[4,128], index: 1, kind: input, shape index: {}]   ;;  %s401_s2 = inlined_call_operand.vmem [shape: f32[1,128], index: 2, kind: input, shape index: {}]   ;;  %s402_s3 = inlined_call_operand.hbm [shape: f32[128,128], index: 3, kind: input, shape index: {}]   ;;  %s403_s4 = inlined_call_operand.vmem [shape: f32[1,128], index: 4, kind: input, shape index: {}]   ;;  %s404_s5 = inlined_call_operand.hbm [shape: f32[8,128], index: 5, kind: output, shape index: {}]  }
   0x1   :  { %11 = vsyncpa [#allocation4], 0  ;;  %s345_s18 = smov [#allocation2]  }
   0x2   :  { %s23_s19 = sshll.u32 %s345_s18, 4  ;;  %s24_s19 = int_to_ptr.vmem [resolvable:$true] %s23_s19 }
   0x3   :  { %s309_s20 = scalar_lea.vmem %s24_s19, 2048  ;;  %p314_p1 = scmp.lt.s32.totalorder %s24_s19, %s24_s19 }
   0x4   :  { %p310_p0 = scmp.ne.s32.totalorder %s24_s19, %s309_s20  ;;  %p315_p2 = scmp.lt.s32.totalorder %s309_s20, %s309_s20 }
   0x6   :  { %p316_p3 = por %p315_p2, %p314_p1 }
   0x8   :  { %p317_p4 = pnand %p316_p3, %p310_p0 }
   0xa   :  { %320 = shalt.err (!%p317_p4)
}
   0xb   :  { %s346_s21 = smov 128   ;;  %s347_s22 = smov 8  }
   0xc   :  { %29 = dma.hbm_to_vmem [thread:$0]  %s402_s3, 2048, %s24_s19, [#allocation3], %s346_s21, %s346_s21, %s347_s22  }
   0xd   :  { %341 = dma.done.wait [#allocation3], 2048  }
   0xe   :  { %342 = vsyncadd [#allocation3], 4294965248  ;;  %v348_v0 = vmov 0.0   ;;  %vm349_vm0 = vmmov 0   ;;  %vm48_vm1 = vcmask 1043456   ;;  %vm44_vm2 = vcmask 31744  }
   0xf   :  { %255 = vmatprep.subr.mxu0 %v348_v0  ;;  %257 = vmatprep.mubr.msk.f32.mxu0 %vm349_vm0, %v348_v0  ;;  %v36_v1 = vld [vmem:[%s400_s1] sm:$0xf]  ;;  %v138_v3 = vld [vmem:[#allocation2 + $0x78] sm:$0xff]  ;;  %v137_v4 = vld [vmem:[#allocation2 + $0x70] sm:$0xff]  ;;  %s350_s30 = smov [#allocation5]  }
  0x10   :  { %260 = vmatprep.subr.mxu1 %v348_v0  ;;  %292 = vmatprep.mubr.msk.f32.mxu1 %vm349_vm0, %v348_v0  ;;  %v35_v2 = vld [vmem:[%s399_s0] sm:$0xff]  ;;  %v136_v5 = vld [vmem:[#allocation2 + $0x68] sm:$0xff]  ;;  %v134_v7 = vld [vmem:[#allocation2 + $0x58] sm:$0xff]  ;;  %s223_s6 = sshll.u32 %s350_s30, 4  ;;  %s224_s6 = int_to_ptr.vmem [resolvable:$true] %s223_s6 }
  0x11   :  { %256 = vmatpush3.msk.msra.mxu0 %vm48_vm1, %v36_v1  ;;  %261 = vmatpush3.msra.mxu1 %v138_v3  ;;  %v135_v6 = vld [vmem:[#allocation2 + $0x60] sm:$0xff]  ;;  %v133_v8 = vld [vmem:[#allocation2 + $0x50] sm:$0xff]  ;;  %v132_v9 = vld [vmem:[#allocation2 + $0x48] sm:$0xff]  ;;  %s321_s7 = scalar_lea.vmem %s224_s6, 128  ;;  %p326_p6 = scmp.lt.s32.totalorder %s224_s6, %s224_s6 }
  0x12   :  { %258 = vmatmul.mubr.msk.f32.vlgmr.msra.gmra.mxu0 %vm44_vm2, %v35_v2  ;;  %262 = vmatprep.subr.mxu1 %v348_v0  ;;  %v131_v10 = vld [vmem:[#allocation2 + $0x40] sm:$0xff]  ;;  %v130_v11 = vld [vmem:[#allocation2 + $0x38] sm:$0xff]  ;;  %v129_v12 = vld [vmem:[#allocation2 + $0x30] sm:$0xff]  ;;  %p322_p5 = scmp.ne.s32.totalorder %s224_s6, %s321_s7  ;;  %p327_p7 = scmp.lt.s32.totalorder %s321_s7, %s321_s7 }
  0x13   :  { %263 = vmatpush3.msra.mxu1 %v137_v4  ;;  %v128_v13 = vld [vmem:[#allocation2 + $0x28] sm:$0xff]  ;;  %v127_v14 = vld [vmem:[#allocation2 + $0x20] sm:$0xff]  ;;  %v126_v15 = vld [vmem:[#allocation2 + $0x18] sm:$0xff] }
  0x14   :  { %264 = vmatprep.subr.mxu1 %v348_v0  ;;  %v125_v16 = vld [vmem:[#allocation2 + $0x10] sm:$0xff]  ;;  %v124_v17 = vld [vmem:[#allocation2 + $0x8] sm:$0xff]  ;;  %v123_v18 = vld [vmem:[#allocation2] sm:$0xff]  ;;  %p328_p8 = por %p327_p7, %p326_p6 }
  0x15   :  { %265 = vmatpush3.msra.mxu1 %v136_v5  ;;  %v232_v19 = vld [vmem:[%s401_s2] ss:$0 sm:$0xff] }
  0x16   :  { %266 = vmatprep.subr.mxu1 %v348_v0  ;;  %v235_v24 = vld [vmem:[%s403_s4] ss:$0 sm:$0xff]  ;;  %p329_p9 = pnand %p328_p8, %p322_p5 }
  0x17   :  { %267 = vmatpush3.msra.mxu1 %v135_v6 }
  0x18   :  { %268 = vmatprep.subr.mxu1 %v348_v0 }
  0x19   :  { %269 = vmatpush3.msra.mxu1 %v134_v7 }
  0x1a   :  { %270 = vmatprep.subr.mxu1 %v348_v0 }
  0x1b   :  { %271 = vmatpush3.msra.mxu1 %v133_v8 }
  0x1c   :  { %272 = vmatprep.subr.mxu1 %v348_v0 }
  0x1d   :  { %273 = vmatpush3.msra.mxu1 %v132_v9 }
  0x1e   :  { %274 = vmatprep.subr.mxu1 %v348_v0 }
  0x1f   :  { %275 = vmatpush3.msra.mxu1 %v131_v10 }
  0x20   :  { %276 = vmatprep.subr.mxu1 %v348_v0 }
  0x21   :  { %277 = vmatpush3.msra.mxu1 %v130_v11 }
  0x22   :  { %278 = vmatprep.subr.mxu1 %v348_v0 }
  0x23   :  { %279 = vmatpush3.msra.mxu1 %v129_v12 }
  0x24   :  { %280 = vmatprep.subr.mxu1 %v348_v0 }
  0x25   :  { %281 = vmatpush3.msra.mxu1 %v128_v13 }
  0x26   :  { %282 = vmatprep.subr.mxu1 %v348_v0 }
  0x27   :  { %283 = vmatpush3.msra.mxu1 %v127_v14 }
  0x28   :  { %284 = vmatprep.subr.mxu1 %v348_v0 }
  0x29   :  { %285 = vmatpush3.msra.mxu1 %v126_v15 }
  0x2a   :  { %286 = vmatprep.subr.mxu1 %v348_v0 }
  0x2b   :  { %287 = vmatpush3.msra.mxu1 %v125_v16 }
  0x2c   :  { %288 = vmatprep.subr.mxu1 %v348_v0 }
  0x2d   :  { %289 = vmatpush3.msra.mxu1 %v124_v17 }
  0x2e   :  { %290 = vmatprep.subr.mxu1 %v348_v0 }
  0x2f   :  { %291 = vmatpush3.msra.mxu1 %v123_v18 }
  0xd2   :  { %v118_v20 = vpop.f32.mrf.mxu0 }
  0xd3   :  { %v119_v21 = vadd.f32 %v232_v19, %v118_v20 }
  0xd4   :  { %v259_v22 = vpop.f32.mrf.mxu0 }
  0xd5   :  { %v122_v23 = vmax.f32 %v119_v21, 0.0 }
  0xd7   :  { %293 = vmatmul.mubr.f32.vlgmr.msra.gmra.mxu1 %v122_v23 }
 0x197   :  { %v212_v25 = vpop.f32.mrf.mxu1 }
 0x198   :  { %v213_v26 = vadd.f32 %v235_v24, %v212_v25 }
 0x199   :  { %v294_v27 = vpop.f32.mrf.mxu1 }
 0x19a   :  { %216 = vst [vmem:[#allocation5] sm:$0xff] %v213_v26 }
 0x19b   :  { %332 = shalt.err (!%p329_p9)
}
 0x19c   :  { %226 = dma.vmem_to_hbm [thread:$0]  %s224_s6, 128, %s404_s5, [#allocation4]  }
 0x19d   :  { %343 = dma.done.wait [#allocation4], 128  }
 0x19e   :  { %344 = vsyncadd [#allocation4], 4294967168 }
 0x19f   :  { %230 = vsyncpa [#allocation3], 1 }
 0x1a0   :  { %231 = vsyncpa [#allocation4], 1 }

</bundles_post_ra>
